<compile_context>
chip_gen: v5e
topology: v5e:2x2
jax: 0.10.0
libtpu: 0.0.40
codegen_flags: <defaults>
</compile_context>

<pallas_src>
import jax
import jax.numpy as jnp
from jax.experimental import pallas as pl
from jax.experimental.pallas import tpu as pltpu

_LANE = 128
_SUBLANE_F32 = 8   # f32 sublane granularity for the row tile


def _round_up(a, b):
    return pl.cdiv(a, b) * b


def _kan_kernel(x_ref, wk_ref, wl_ref, b_ref, o_ref):
    # x_ref:  (TM, input_dim)     native dtype (f32); cast in-register below
    # wk_ref: (input_dim, Kp)     pre-transposed kernel weights (bf16, zero-padded)
    # wl_ref: (Kp, output_dim)    pre-transposed linear weights (bf16, zero-padded rows)
    # b_ref:  (1, output_dim)     f32 bias
    # o_ref:  (TM, output_dim)    output tile (caller dtype)
    x = x_ref[...].astype(wk_ref.dtype)            # in-kernel cast, hides under DMA
    kf = jnp.dot(x, wk_ref[...], preferred_element_type=jnp.float32)
    kf = jnp.maximum(kf, 0.0).astype(wl_ref.dtype)
    out = jnp.dot(kf, wl_ref[...], preferred_element_type=jnp.float32)
    o_ref[...] = (out + b_ref[...]).astype(o_ref.dtype)


def _choose_row_tile(M, tm_target):
    """Pick the row-tile size.

    Targets tm_target rows/step, but guarantees at least min(4, cdiv(M, 8))
    grid steps (so the "parallel" grid axis can use both v7x TensorCores) and
    rounds tm up to a multiple of 8 so tail-padding waste is <= 7 rows.
    """
    max_useful_steps = pl.cdiv(M, _SUBLANE_F32)
    min_steps = min(4, max_useful_steps)
    steps = max(pl.cdiv(M, tm_target), min_steps)
    return _round_up(pl.cdiv(M, steps), _SUBLANE_F32)


def kan_layer(x, kernel_weights, lin_weight, lin_bias, *,
              tm=8192, compute_dtype=jnp.bfloat16):
    """x: (..., input_dim) -> (..., output_dim), matching KANLayer.forward."""
    *lead, input_dim = x.shape
    kernel_size = kernel_weights.shape[0]
    output_dim = lin_weight.shape[0]
    M = 1
    for d in lead:
        M *= d

    out_dtype = x.dtype

    # Lane-dense padding of the tiny contraction axis (paid once; weights are
    # VMEM-resident across all grid steps).
    k_pad = _round_up(kernel_size, _LANE)

    tm = _choose_row_tile(M, tm)
    grid = pl.cdiv(M, tm)   # Pallas masks the ragged last tile; no row padding.

    # --- wrapper-side prep: only the small, M-independent parameters --------
    x2 = x.reshape(M, input_dim)  # native dtype; no cast / pad pass over x

    wk_t = jnp.zeros((input_dim, k_pad), compute_dtype)
    wk_t = wk_t.at[:, :kernel_size].set(kernel_weights.T.astype(compute_dtype))

    wl_t = jnp.zeros((k_pad, output_dim), compute_dtype)
    wl_t = wl_t.at[:kernel_size, :].set(lin_weight.T.astype(compute_dtype))

    b2 = lin_bias.astype(jnp.float32).reshape(1, output_dim)

    out = pl.pallas_call(
        _kan_kernel,
        out_shape=jax.ShapeDtypeStruct((M, output_dim), out_dtype),
        grid_spec=pltpu.PrefetchScalarGridSpec(
            num_scalar_prefetch=0,
            grid=(grid,),
            in_specs=[
                pl.BlockSpec((tm, input_dim), lambda i: (i, 0)),      # x rows
                pl.BlockSpec((input_dim, k_pad), lambda i: (0, 0)),   # VMEM-resident
                pl.BlockSpec((k_pad, output_dim), lambda i: (0, 0)),  # VMEM-resident
                pl.BlockSpec((1, output_dim), lambda i: (0, 0)),      # VMEM-resident
            ],
            out_specs=pl.BlockSpec((tm, output_dim), lambda i: (i, 0)),
        ),
        compiler_params=pltpu.CompilerParams(
            dimension_semantics=("parallel",),   # shard rows across TCs on v7x
        ),
    )(x2, wk_t, wl_t, b2)

    return out.reshape(*lead, output_dim)


def _reference(x, kernel_weights, lin_weight, lin_bias):
    kf = jnp.maximum(jnp.matmul(x, kernel_weights.T), 0.0)
    return jnp.matmul(kf, lin_weight.T) + lin_bias


if __name__ == "__main__":
    # Small shapes consistent with the module:
    batch, seq, input_dim = 2, 8, 32
    kernel_size, output_dim = 8, 16

    key = jax.random.PRNGKey(0)
    kx, kw, klw, klb = jax.random.split(key, 4)

    x = jax.random.normal(kx, (batch, seq, input_dim), dtype=jnp.float32)

    # Parameters (deterministic, mimicking nn init shapes):
    #   kernel_weights ~ randn(kernel_size, input_dim)
    #   linear: weight (output_dim, kernel_size), bias (output_dim,)
    kernel_weights = jax.random.normal(kw, (kernel_size, input_dim), dtype=jnp.float32)
    bound = 1.0 / (kernel_size ** 0.5)
    lin_weight = jax.random.uniform(
        klw, (output_dim, kernel_size), minval=-bound, maxval=bound, dtype=jnp.float32
    )
    lin_bias = jax.random.uniform(
        klb, (output_dim,), minval=-bound, maxval=bound, dtype=jnp.float32
    )

    out = kan_layer(x, kernel_weights, lin_weight, lin_bias)
    out = jax.block_until_ready(out)

    ref = _reference(x, kernel_weights, lin_weight, lin_bias)
    assert out.shape == (batch, seq, output_dim), out.shape

    # Tolerance loosened vs the f32 reference because the matmuls run in bf16
    # (accumulation stays f32), per the perf-review correctness note.
    max_err = float(jnp.max(jnp.abs(out - ref)))
    scale = float(jnp.max(jnp.abs(ref)))
    assert max_err <= 3e-2 * scale + 1e-3, (max_err, scale)

    print("KERNEL_OK")
</pallas_src>

<mosaic_0001>
module attributes {stable_mosaic.version = 11 : i64} {
  func.func @_kan_kernel(%arg0: i32, %arg1: memref<8x32xf32, #tpu.memory_space<vmem>>, %arg2: memref<32x128xbf16, #tpu.memory_space<vmem>>, %arg3: memref<128x16xbf16, #tpu.memory_space<vmem>>, %arg4: memref<1x16xf32, #tpu.memory_space<vmem>>, %arg5: memref<8x16xf32, #tpu.memory_space<vmem>>) attributes {dimension_semantics = [#tpu.dimension_semantics<parallel>], iteration_bounds = array<i64: 2>, scalar_prefetch = 0 : i64, scratch_operands = 0 : i64, tpu.core_type = #tpu.core_type<tc>, window_params = [{transform_indices = @transform_0, window_bounds = array<i64: 8, 32>}, {pipeline_mode = #tpu.pipeline_mode<synchronous>, transform_indices = @transform_1, window_bounds = array<i64: 32, 128>}, {pipeline_mode = #tpu.pipeline_mode<synchronous>, transform_indices = @transform_2, window_bounds = array<i64: 128, 16>}, {pipeline_mode = #tpu.pipeline_mode<synchronous>, transform_indices = @transform_3, window_bounds = array<i64: 1, 16>}, {transform_indices = @transform_4, window_bounds = array<i64: 8, 16>}]} {
    %c0 = arith.constant 0 : index
    %c0_0 = arith.constant 0 : index
    %0 = vector.load %arg1[%c0, %c0_0] : memref<8x32xf32, #tpu.memory_space<vmem>>, vector<8x32xf32>
    %1 = arith.truncf %0 : vector<8x32xf32> to vector<8x32xbf16>
    %c0_1 = arith.constant 0 : index
    %c0_2 = arith.constant 0 : index
    %2 = vector.load %arg2[%c0_1, %c0_2] : memref<32x128xbf16, #tpu.memory_space<vmem>>, vector<32x128xbf16>
    %cst = arith.constant dense<0.000000e+00> : vector<8x128xf32>
    %3 = tpu.matmul %1, %2, %cst {dimension_numbers = #tpu.dot_dimension_numbers<[1], [0], [0], [1], [0, 0, 1, 1], [], []>} : vector<8x32xbf16>, vector<32x128xbf16>, vector<8x128xf32> -> vector<8x128xf32>
    %cst_3 = arith.constant 0.000000e+00 : f32
    %4 = vector.broadcast %cst_3 : f32 to vector<8x128xf32>
    %5 = arith.maximumf %3, %4 : vector<8x128xf32>
    %6 = arith.truncf %5 : vector<8x128xf32> to vector<8x128xbf16>
    %c0_4 = arith.constant 0 : index
    %c0_5 = arith.constant 0 : index
    %7 = vector.load %arg3[%c0_4, %c0_5] : memref<128x16xbf16, #tpu.memory_space<vmem>>, vector<128x16xbf16>
    %cst_6 = arith.constant dense<0.000000e+00> : vector<8x16xf32>
    %8 = tpu.matmul %6, %7, %cst_6 {dimension_numbers = #tpu.dot_dimension_numbers<[1], [0], [0], [1], [0, 0, 1, 1], [], []>} : vector<8x128xbf16>, vector<128x16xbf16>, vector<8x16xf32> -> vector<8x16xf32>
    %c0_7 = arith.constant 0 : index
    %c0_8 = arith.constant 0 : index
    %9 = vector.load %arg4[%c0_7, %c0_8] : memref<1x16xf32, #tpu.memory_space<vmem>>, vector<1x16xf32>
    %10 = vector.broadcast %9 : vector<1x16xf32> to vector<8x16xf32>
    %11 = arith.addf %8, %10 : vector<8x16xf32>
    %c0_9 = arith.constant 0 : index
    %c0_10 = arith.constant 0 : index
    %12 = vector.load %arg5[%c0_9, %c0_10] : memref<8x16xf32, #tpu.memory_space<vmem>>, vector<8x16xf32>
    tpu.vector_store %arg5[%c0_9, %c0_10], %11 {strides = array<i32>} : memref<8x16xf32, #tpu.memory_space<vmem>>, vector<8x16xf32>,
    return
  }
  func.func @transform_0(%arg0: i32) -> (i32, i32) {
    %c0_i32 = arith.constant 0 : i32
    %c0_i32_0 = arith.constant 0 : i32
    return %arg0, %c0_i32 : i32, i32
  }
  func.func @transform_1(%arg0: i32) -> (i32, i32) {
    %c0_i32 = arith.constant 0 : i32
    %c0_i32_0 = arith.constant 0 : i32
    %c0_i32_1 = arith.constant 0 : i32
    return %c0_i32, %c0_i32_0 : i32, i32
  }
  func.func @transform_2(%arg0: i32) -> (i32, i32) {
    %c0_i32 = arith.constant 0 : i32
    %c0_i32_0 = arith.constant 0 : i32
    %c0_i32_1 = arith.constant 0 : i32
    return %c0_i32, %c0_i32_0 : i32, i32
  }
  func.func @transform_3(%arg0: i32) -> (i32, i32) {
    %c0_i32 = arith.constant 0 : i32
    %c0_i32_0 = arith.constant 0 : i32
    %c0_i32_1 = arith.constant 0 : i32
    return %c0_i32, %c0_i32_0 : i32, i32
  }
  func.func @transform_4(%arg0: i32) -> (i32, i32) {
    %c0_i32 = arith.constant 0 : i32
    %c0_i32_0 = arith.constant 0 : i32
    return %arg0, %c0_i32 : i32, i32
  }
}

</mosaic_0001>

<bundles_post_ra>
// kernel: tpu_custom_call.1
= control target key start
LH: loop header
LB: loop body
LE: loop exit
PB: predicated region body
PF: predicated region fallthrough
CT: control target
= control target key end

     0   :  { %9 = vsyncpa [#allocation3], 0  ;;  %s697_s0 = inlined_call_operand.vmem [shape: f32[16,32], index: 0, kind: input, shape index: {}]   ;;  %s698_s1 = inlined_call_operand.vmem [shape: bf16[32,128], index: 1, kind: input, shape index: {}]   ;;  %s699_s2 = inlined_call_operand.vmem [shape: bf16[128,16], index: 2, kind: input, shape index: {}]   ;;  %s700_s3 = inlined_call_operand.vmem [shape: f32[1,16], index: 3, kind: input, shape index: {}]   ;;  %s701_s4 = inlined_call_operand.hbm [shape: f32[16,16], index: 4, kind: output, shape index: {}]  }
   0x1   :  { %11 = vsyncpa [#allocation3 + $0x1], 0  ;;  %s579_s15 = smov 0   ;;  %s581_s16 = smov 0  }
   0x2   :  { %s583_s17 = smov 0   ;;  %s585_s18 = smov 0  }
   0x3 LB: > { %s600_s19 = sadd.s32 4294967295, %s552_s18   ;;  %s389_s20 = sadd.s32 4294967294, %s552_s18   ;;  %s552_s18 = sphi %s585_s18, %s707_s18   ;;  %s548_s17 = sphi %s583_s17, %s706_s17   ;;  %s544_s16 = sphi %s581_s16, %s705_s16   ;;  %s540_s15 = sphi %s579_s15, %s704_s15  }
   0x4   : > { %s604_s21 = sadd.s32 1, %s552_s18   ;;  %s113_s22 = sadd.s32 1, %s548_s17 }
   0x5   : > { %s110_s23 = ssub.s32 %s552_s18, %s604_s21  ;;  %p123_p0 = scmp.ne.s32.totalorder %s548_s17, %s544_s16 }
   0x6   : > { %p111_p1 = scmp.eq.s32.totalorder %s110_s23, 0  ;;  %p124_p2 = scmp.eq.s32.totalorder %s600_s19, 1 }
   0x7   : > { %p129_p3 = scmp.ne.s32.totalorder %s544_s16, %s540_s15  ;;  %p130_p4 = scmp.eq.s32.totalorder %s389_s20, 1 }
   0x8   : > { %s615_s24 = scalar_select %p111_p1, %s548_s17, %s113_s22  }
   0x9   : > { %p617_p5 = por %p124_p2, %p123_p0  ;;  %p621_p6 = por %p130_p4, %p129_p3 }
   0xa   : > { %p392_p7 = scmp.ge.s32.totalorder %s552_s18, 1  ;;  %p164_p8 = scmp.lt.s32.totalorder %s552_s18, 3 }
   0xc   : > { %p165_p9 = pnand %p392_p7, %p164_p8 }
   0xd   : > { %p189_p10 = scmp.lt.s32.totalorder (!%p165_p9), %s600_s19, 1  ;;  %s186_s9 = sand.u32 (!%p165_p9), 1, %s544_s16  }
   0xe   : > { %168 = sbr.rel (%p165_p9) target bundleno = 291 (0x123), region = 36  ;;  %s393_s11 = sshll.u32 (!%p165_p9), %s186_s9, 3 }
   0xf   : > { %s188_s23 = scalar_lea.vmem (!%p165_p9), [#allocation2], %s393_s11 }
  0x10   : > { %s327_s27 = sshll.u32 (!%p165_p9), %s188_s23, 4  ;;  %s328_s27 = int_to_ptr.vmem [resolvable:$true] %s327_s27 }
  0x13   : > { %v441_v0 = vld [vmem:[%s698_s1 + $0x8] sm:$0xff]  ;;  %v449_v1 = vld [vmem:[%s699_s2 + $0x38] sm:$0xff]  ;;  %v440_v2 = vld [vmem:[%s698_s1] sm:$0xff]  ;;  %s190_s7 = scalar_select %p189_p10, %s600_s19, 1  ;;  %vm212_vm0 = vcmask 261120   ;;  %vm312_vm1 = vcmask 130048  }
  0x14   : > { %222 = vmatpush.bf16.msra.mxu0 %v441_v0  ;;  %299 = vmatpush.bf16.msra.mxu1 %v449_v1  ;;  %v448_v3 = vld [vmem:[%s699_s2 + $0x30] sm:$0xff]  ;;  %v447_v5 = vld [vmem:[%s699_s2 + $0x28] sm:$0xff]  ;;  %v446_v7 = vld [vmem:[%s699_s2 + $0x20] sm:$0xff] }
  0x15   : > { %s394_s10 = sshll.u32 %s190_s7, 3  ;;  %v445_v8 = vld [vmem:[%s699_s2 + $0x18] sm:$0xff]  ;;  %v444_v9 = vld [vmem:[%s699_s2 + $0x10] sm:$0xff]  ;;  %v443_v10 = vld [vmem:[%s699_s2 + $0x8] sm:$0xff]  ;;  %s510_s7 = scalar_lea.hbm %s701_s4, 16 }
  0x16   : > { %s192_s13 = scalar_lea.vmem %s697_s0, %s394_s10  ;;  %v442_v11 = vld [vmem:[%s699_s2] sm:$0xff]  ;;  %s437_s10 = sshll.u32 %s600_s19, 3 }
  0x17   : > { %v194_v4 = vld [vmem:[%s192_s13] sm:$0xff]  ;;  %s325_s14 = scalar_lea.hbm %s701_s4, %s437_s10  ;;  %s315_s19 = scalar_lea.sflag [#allocation3], %s186_s9 }
  0x18   : > { %223 = vmatpush.bf16.msra.mxu0 %v440_v2  ;;  %300 = vmatpush.bf16.msra.mxu1 %v448_v3  ;;  %v195_v6 = vpack.c.bf16 %v194_v4, %v194_v4  ;;  %v489_v16 = vld [vmem:[%s700_s3] ss:$0 sm:$0xff]  ;;  %s329_s28 = sshll.u32 %s325_s14, 4  ;;  %s330_s28 = int_to_ptr.hbm [resolvable:$true] %s329_s28 }
  0x19   : > { %s504_s29 = sshra.s32 %s330_s28, 4  ;;  %s505_s29 = int_to_ptr.hbm [resolvable:$true] %s504_s29 }
  0x1a   : > { %s506_s30 = scalar_lea.hbm %s505_s29, 8  ;;  %p511_p0 = scmp.lt.s32.totalorder %s505_s29, %s701_s4 }
  0x1b   : > { %403 = vmatmul.msk.bf16.vlgmr.msra.gmra.mxu0 %vm212_vm0, %v195_v6  ;;  %p507_p11 = scmp.ne.s32.totalorder %s505_s29, %s506_s30  ;;  %p512_p1 = scmp.lt.s32.totalorder %s510_s7, %s506_s30 }
  0x1c   : > { %301 = vmatpush.bf16.msra.mxu1 %v447_v5 }
  0x1d   : > { %p508_p12 = pnand %p507_p11, %p617_p5  ;;  %p513_p2 = por %p512_p1, %p511_p0 }
  0x1f   : > { %p509_p13 = pneg %p508_p12 }
  0x20   : > { %302 = vmatpush.bf16.msra.mxu1 %v446_v7 }
  0x21   : > { %p514_p3 = pnand %p513_p2, %p509_p13 }
  0x24   : > { %303 = vmatpush.bf16.msra.mxu1 %v445_v8 }
  0x28   : > { %304 = vmatpush.bf16.msra.mxu1 %v444_v9 }
  0x2c   : > { %305 = vmatpush.bf16.msra.mxu1 %v443_v10 }
  0x30   : > { %306 = vmatpush.bf16.msra.mxu1 %v442_v11 }
  0x98   : > { %v225_v12 = vpop.f32.mrf.mxu0 }
  0x99   : > { %v229_v13 = vmax.f32 %v225_v12, 0.0 }
  0x9b   : > { %v230_v14 = vpack.c.bf16 %v229_v13, %v229_v13 }
  0x9d   : > { %307 = vmatmul.bf16.vlgmr.msra.gmra.mxu1 %v230_v14 }
  0xa0   : > { %v227_v15 = vpop.f32.mrf.mxu0 }
 0x11a   : > { %v308_v17 = vpop.f32.mrf.mxu1 }
 0x11b   : > { %v309_v18 = vadd.f32 %v489_v16, %v308_v17 }
 0x11d   : > { %313 = vst.msk [vmem:[%s188_s23] sm:$0xff] %vm312_vm1, %v309_v18 }
 0x11e   : > { %517 = shalt.err (!%p514_p3)
}
 0x11f   : > { %450 = dma.vmem_to_hbm [thread:$0]  (%p617_p5), %s328_s27, 128, %s330_s28, %s315_s19  }
 0x122   : > { %v310_v19 = vpop.f32.mrf.mxu1 }
 0x123 PF: > { %p456_p4 = scmp.ge.s32.totalorder %s552_s18, 2  ;;  %s341_s9 = sand.u32 1, %s540_s15  }
 0x124   : > { %s342_s11 = scalar_lea.sflag [#allocation3], %s341_s9 }
 0x125   : > { %p453_p7 = pnand %p456_p4, %p621_p6 }
 0x127   : > { %p454_p8 = pneg %p453_p7 }
 0x129   : > { %535 = dma.done.wait (%p454_p8), %s342_s11, 128  }
 0x12a   : > { %537 = vsyncadd (%p454_p8), %s342_s11, 4294967168  ;;  %p14_p9 = scmp.ge.s32.totalorder %s604_s21, 4   ;;  %s704_s15 = smov %s544_s16 }
 0x12b   : > { %s705_s16 = smov %s548_s17  ;;  %s706_s17 = smov %s615_s24 }
 0x12c   : > { %s707_s18 = smov %s604_s21  ;;  %16 = sbr.rel (!%p14_p9) target bundleno = 3 (0x3), region = 71 }
 0x131   :  { %348 = vsyncpa [#allocation3], 1 }
 0x132   :  { %350 = vsyncpa [#allocation3 + $0x1], 1 }

</bundles_post_ra>
